<compile_context>
chip_gen: v7x
topology: tpu7x:2x2x1
jax: 0.10.0
libtpu: 0.0.40
codegen_flags: <defaults>
</compile_context>

<pallas_src>
import jax
import jax.numpy as jnp
from jax import lax
from jax.experimental import pallas as pl
from jax.experimental.pallas import tpu as pltpu

ACTIVATION_DIM = 512  # matches `activation_dim = 512` in the reference script


def _probe_kernel(x_ref, w_ref, b_ref, o_ref):
    # x_ref: (TB, D) native dtype (VMEM, double-buffered over the grid)
    # w_ref: (D, 1)  x's dtype   (same block every step -> VMEM-resident)
    # b_ref: (1,)    f32 scalar in SMEM
    # o_ref: (TB, 1) f32
    logits = jnp.dot(
        x_ref[...],
        w_ref[...],
        preferred_element_type=jnp.float32,   # f32 accumulation on the MXU
        precision=lax.Precision.HIGHEST,      # keep f32 inputs at full precision
    )
    o_ref[...] = logits + b_ref[0]


def probe_forward(x, weight, bias, *, tb=2048):
    """Pallas forward of Probe.

    x: (..., D) f32 or bf16, weight: (1, D), bias: (1,)  ->  logits (...,) f32.
    """
    D = x.shape[-1]
    assert weight.shape == (1, D)
    assert bias.shape == (1,)

    lead_shape = x.shape[:-1]
    x2 = x.reshape(-1, D)          # nn.Linear broadcasts over leading dims
    B = x2.shape[0]

    # Batch tile: shrink for small B, round up to a sublane multiple (8).
    # No padding of x: the ragged last block is masked by Pallas.
    tb = min(tb, B)
    tb = max(8, ((tb + 7) // 8) * 8)
    num_tiles = pl.cdiv(B, tb)

    # Weight as a (D, 1) column in x's dtype -> bf16 feeds the MXU natively.
    w_col = weight.reshape(D, 1).astype(x2.dtype)
    b_f32 = bias.astype(jnp.float32)

    cost = pl.CostEstimate(
        flops=2 * B * D,
        transcendentals=0,
        bytes_accessed=B * D * x2.dtype.itemsize + D * w_col.dtype.itemsize + B * 4,
    )

    out = pl.pallas_call(
        _probe_kernel,
        out_shape=jax.ShapeDtypeStruct((B, 1), jnp.float32),
        grid_spec=pltpu.PrefetchScalarGridSpec(
            num_scalar_prefetch=0,
            grid=(num_tiles,),
            in_specs=[
                # activation stream: tiled over batch, double-buffered by Pallas
                pl.BlockSpec((tb, D), lambda i: (i, 0)),
                # weight column: same block every step -> stays resident in VMEM
                pl.BlockSpec((D, 1), lambda i: (0, 0)),
                # bias: single scalar, keep it in SMEM
                pl.BlockSpec(memory_space=pltpu.MemorySpace.SMEM),
            ],
            out_specs=pl.BlockSpec((tb, 1), lambda i: (i, 0)),
        ),
        compiler_params=pltpu.CompilerParams(
            # independent batch tiles: shard across TensorCores (2 TCs on v7x)
            dimension_semantics=("parallel",),
        ),
        cost_estimate=cost,
    )(x2, w_col, b_f32)

    # .squeeze(-1) from the PyTorch forward + restore leading dims (glue only)
    return out[:, 0].reshape(lead_shape)


def _ref(x, weight, bias):
    # Mirrors the kernel's precision path: weight cast to x's dtype, then f32 math.
    w = weight.astype(x.dtype).astype(jnp.float32)
    return jnp.sum(x.astype(jnp.float32) * w, axis=-1) + bias[0]


if __name__ == "__main__":
    key = jax.random.PRNGKey(0)
    kx, kw, kb, kx2 = jax.random.split(key, 4)

    D = ACTIVATION_DIM
    bound = 1.0 / (D ** 0.5)
    # nn.Linear(D, 1): weight (1, D), bias (1,)
    weight = jax.random.uniform(kw, (1, D), jnp.float32, -bound, bound)
    bias = jax.random.uniform(kb, (1,), jnp.float32, -bound, bound)

    # Case 1: small batch (single full-block tile), f32
    B1 = 8
    x1 = jax.random.normal(kx, (B1, D), jnp.float32)
    out1 = probe_forward(x1, weight, bias)
    jax.block_until_ready(out1)
    assert out1.shape == (B1,)
    assert jnp.allclose(out1, _ref(x1, weight, bias), atol=1e-4, rtol=1e-4)

    # Case 2: multi-tile grid with a ragged last block (no wrapper-side pad)
    B2 = 20
    x2 = jax.random.normal(kx2, (B2, D), jnp.float32)
    out2 = probe_forward(x2, weight, bias, tb=8)
    jax.block_until_ready(out2)
    assert out2.shape == (B2,)
    assert jnp.allclose(out2, _ref(x2, weight, bias), atol=1e-4, rtol=1e-4)

    # Case 3: bf16 activations streamed natively into the MXU, f32 accumulation
    x3 = x1.astype(jnp.bfloat16)
    out3 = probe_forward(x3, weight, bias)
    jax.block_until_ready(out3)
    assert jnp.allclose(out3, _ref(x3, weight, bias), atol=1e-3, rtol=1e-3)

    print("KERNEL_OK")
</pallas_src>

<mosaic_0001>
module attributes {stable_mosaic.version = 11 : i64} {
  func.func @_probe_kernel(%arg0: i32, %arg1: memref<8x512xf32, #tpu.memory_space<vmem>>, %arg2: memref<512x1xf32, #tpu.memory_space<vmem>>, %arg3: memref<1xf32, #tpu.memory_space<smem>>, %arg4: memref<8x1xf32, #tpu.memory_space<vmem>>) attributes {dimension_semantics = [#tpu.dimension_semantics<parallel>], iteration_bounds = array<i64: 1>, scalar_prefetch = 0 : i64, scratch_operands = 0 : i64, tpu.core_type = #tpu.core_type<tc>, window_params = [{transform_indices = @transform_0, window_bounds = array<i64: 8, 512>}, {pipeline_mode = #tpu.pipeline_mode<synchronous>, transform_indices = @transform_1, window_bounds = array<i64: 512, 1>}, {transform_indices = @transform_2, window_bounds = array<i64: 1>}, {transform_indices = @transform_3, window_bounds = array<i64: 8, 1>}]} {
    %c0 = arith.constant 0 : index
    %c0_0 = arith.constant 0 : index
    %0 = vector.load %arg1[%c0, %c0_0] : memref<8x512xf32, #tpu.memory_space<vmem>>, vector<8x512xf32>
    %c0_1 = arith.constant 0 : index
    %c0_2 = arith.constant 0 : index
    %1 = vector.load %arg2[%c0_1, %c0_2] : memref<512x1xf32, #tpu.memory_space<vmem>>, vector<512x1xf32>
    %cst = arith.constant dense<0.000000e+00> : vector<8x1xf32>
    %2 = tpu.matmul %0, %1, %cst {dimension_numbers = #tpu.dot_dimension_numbers<[1], [0], [0], [1], [0, 0, 1, 1], [], []>, precision = #tpu.contract_precision<fp32>} : vector<8x512xf32>, vector<512x1xf32>, vector<8x1xf32> -> vector<8x1xf32>
    %c0_3 = arith.constant 0 : index
    %3 = memref.load %arg3[%c0_3] : memref<1xf32, #tpu.memory_space<smem>>
    %4 = vector.broadcast %3 : f32 to vector<8x1xf32>
    %5 = arith.addf %2, %4 : vector<8x1xf32>
    %c0_4 = arith.constant 0 : index
    %c0_5 = arith.constant 0 : index
    %6 = vector.load %arg4[%c0_4, %c0_5] : memref<8x1xf32, #tpu.memory_space<vmem>>, vector<8x1xf32>
    tpu.vector_store %arg4[%c0_4, %c0_5], %5 {strides = array<i32>} : memref<8x1xf32, #tpu.memory_space<vmem>>, vector<8x1xf32>,
    return
  }
  func.func @transform_0(%arg0: i32) -> (i32, i32) {
    %c0_i32 = arith.constant 0 : i32
    %c0_i32_0 = arith.constant 0 : i32
    return %arg0, %c0_i32 : i32, i32
  }
  func.func @transform_1(%arg0: i32) -> (i32, i32) {
    %c0_i32 = arith.constant 0 : i32
    %c0_i32_0 = arith.constant 0 : i32
    %c0_i32_1 = arith.constant 0 : i32
    return %c0_i32, %c0_i32_0 : i32, i32
  }
  func.func @transform_2(%arg0: i32) -> i32 {
    %c0_i32 = arith.constant 0 : i32
    %c0_i32_0 = arith.constant 0 : i32
    return %c0_i32 : i32
  }
  func.func @transform_3(%arg0: i32) -> (i32, i32) {
    %c0_i32 = arith.constant 0 : i32
    %c0_i32_0 = arith.constant 0 : i32
    return %arg0, %c0_i32 : i32, i32
  }
}

</mosaic_0001>

<bundles_post_ra>
// kernel: tpu_custom_call.1
= control target key start
LH: loop header
LB: loop body
LE: loop exit
PB: predicated region body
PF: predicated region fallthrough
CT: control target
= control target key end

     0   :  { %vm1809_vm0 = vcmask 7168   ;;  %s3718_s1 = inlined_call_operand.vmem [shape: f32[512,1], index: 1, kind: input, shape index: {}]   ;;  %s3719_s0 = inlined_call_operand.vmem [shape: f32[8,512], index: 0, kind: input, shape index: {}]   ;;  %s3720_s2 = inlined_call_operand.<no memory space> [shape: f32[1], index: 2, kind: input, shape index: {}]   ;;  %s3721_s3 = inlined_call_operand.vmem [shape: f32[8,1], index: 3, kind: output, shape index: {}]  }
   0x1   :  { %v35_v0 = vld [vmem:[%s3718_s1 + $0x80] sm:$0xff]  ;;  %v36_v1 = vld [vmem:[%s3718_s1 + $0x88] sm:$0xff]  ;;  %v37_v7 = vld [vmem:[%s3718_s1 + $0x90] sm:$0xff] }
   0x2   :  { %v19_v2 = vld [vmem:[%s3718_s1] sm:$0xff]  ;;  %v134_v3 = vand.u32 4294901760, %v35_v0  ;;  %v137_v4 = vand.u32 4294901760, %v36_v1  ;;  %v20_v5 = vld [vmem:[%s3718_s1 + $0x8] sm:$0xff]  ;;  %v38_v8 = vld [vmem:[%s3718_s1 + $0x98] sm:$0xff]  ;;  %v140_v10 = vand.u32 4294901760, %v37_v7 }
   0x3   :  { %v86_v6 = vand.u32 4294901760, %v19_v2  ;;  %v89_v9 = vand.u32 4294901760, %v20_v5  ;;  %v143_v11 = vand.u32 4294901760, %v38_v8  ;;  %v21_v12 = vld [vmem:[%s3718_s1 + $0x10] sm:$0xff]  ;;  %v22_v13 = vld [vmem:[%s3718_s1 + $0x18] sm:$0xff]  ;;  %v39_v18 = vld [vmem:[%s3718_s1 + $0xa0] sm:$0xff] }
   0x4   :  { %v2663_v14 = vpack.c.bf16 %v137_v4, %v134_v3  ;;  %v92_v16 = vand.u32 4294901760, %v21_v12  ;;  %v95_v17 = vand.u32 4294901760, %v22_v13  ;;  %v40_v19 = vld [vmem:[%s3718_s1 + $0xa8] sm:$0xff]  ;;  %v23_v23 = vld [vmem:[%s3718_s1 + $0x20] sm:$0xff]  ;;  %v2686_v25 = vsub.f32 %v37_v7, %v140_v10  ;;  %v41_v37 = vld [vmem:[%s3718_s1 + $0xb0] sm:$0xff] }
   0x5   :  { %v2665_v15 = vsub.f32 %v19_v2, %v86_v6  ;;  %v2673_v20 = vpack.c.bf16 %v89_v9, %v86_v6  ;;  %v2675_v21 = vsub.f32 %v20_v5, %v89_v9  ;;  %v2677_v22 = vpack.c.bf16 %v143_v11, %v140_v10  ;;  %v24_v24 = vld [vmem:[%s3718_s1 + $0x28] sm:$0xff]  ;;  %v42_v42 = vld [vmem:[%s3718_s1 + $0xb8] sm:$0xff]  ;;  %v25_v55 = vld [vmem:[%s3718_s1 + $0x30] sm:$0xff] }
   0x6   :  { %2236 = vmatprep.subr.bf16.mxu0 %v2663_v14  ;;  %v2688_v26 = vsub.f32 %v38_v8, %v143_v11  ;;  %v2690_v27 = vpack.c.bf16 %v95_v17, %v92_v16  ;;  %v2692_v28 = vsub.f32 %v21_v12, %v92_v16  ;;  %v146_v29 = vand.u32 4294901760, %v39_v18  ;;  %v26_v56 = vld [vmem:[%s3718_s1 + $0x38] sm:$0xff]  ;;  %v43_v5 = vld [vmem:[%s3718_s1 + $0xc0] sm:$0xff]  ;;  %v44_v6 = vld [vmem:[%s3718_s1 + $0xc8] sm:$0xff] }
   0x7   :  { %2238 = vmatpush3.bf16.msra.mxu0 %v2673_v20  ;;  %v149_v30 = vand.u32 4294901760, %v40_v19  ;;  %v2695_v31 = vsub.f32 %v35_v0, %v134_v3  ;;  %v2697_v32 = vsub.f32 %v36_v1, %v137_v4  ;;  %v98_v33 = vand.u32 4294901760, %v23_v23  ;;  %v27_v11 = vld [vmem:[%s3718_s1 + $0x40] sm:$0xff] }
   0x8   :  { %2240 = vmatprep.subr.bf16.mxu0 %v2677_v22  ;;  %v101_v34 = vand.u32 4294901760, %v24_v24  ;;  %v3738_v35 = vand.u32 4294901760, %v2665_v15  ;;  %v3737_v36 = vand.u32 4294901760, %v2675_v21  ;;  %v2705_v38 = vsub.f32 %v22_v13, %v95_v17 }
   0x9   :  { %v2707_v39 = vpack.c.bf16 %v149_v30, %v146_v29  ;;  %v2709_v40 = vsub.f32 %v39_v18, %v146_v29  ;;  %v3743_v41 = vand.u32 4294901760, %v2695_v31  ;;  %v2715_v43 = vsub.f32 %v40_v19, %v149_v30  ;;  %v28_v29 = vld [vmem:[%s3718_s1 + $0x48] sm:$0xff] }
   0xa   :  { %v3740_v44 = vand.u32 4294901760, %v2697_v32  ;;  %v2718_v45 = vpack.c.bf16 %v101_v34, %v98_v33  ;;  %v2720_v46 = vsub.f32 %v23_v23, %v98_v33  ;;  %v201_v48 = vsub.f32 %v2665_v15, %v3738_v35 }
   0xb   :  { %2242 = vmatpush3.bf16.msra.mxu0 %v2690_v27  ;;  %v313_v47 = vsub.f32 %v2695_v31, %v3743_v41  ;;  %v208_v49 = vsub.f32 %v2675_v21, %v3737_v36  ;;  %v152_v50 = vand.u32 4294901760, %v41_v37  ;;  %v155_v52 = vand.u32 4294901760, %v42_v42 }
   0xc   :  { %2244 = vmatprep.subr.bf16.mxu0 %v2707_v39  ;;  %v320_v51 = vsub.f32 %v2697_v32, %v3740_v44  ;;  %v3735_v53 = vand.u32 4294901760, %v2686_v25  ;;  %v3734_v54 = vand.u32 4294901760, %v2688_v26  ;;  %v2744_v58 = vsub.f32 %v24_v24, %v101_v34 }
   0xd   :  { %v314_v57 = vand.u32 4294901760, %v313_v47  ;;  %v202_v59 = vand.u32 4294901760, %v201_v48  ;;  %v209_v60 = vand.u32 4294901760, %v208_v49  ;;  %v2746_v62 = vpack.c.bf16 %v155_v52, %v152_v50 }
   0xe   :  { %v321_v61 = vand.u32 4294901760, %v320_v51  ;;  %v2748_v63 = vsub.f32 %v41_v37, %v152_v50  ;;  %v327_v0 = vsub.f32 %v2686_v25, %v3735_v53  ;;  %v334_v2 = vsub.f32 %v2688_v26, %v3734_v54 }
   0xf   :  { %2246 = vmatpush3.bf16.msra.mxu0 %v2718_v45  ;;  %v2269_v1 = vpack.c.bf16 %v209_v60, %v202_v59  ;;  %v104_v3 = vand.u32 4294901760, %v25_v55  ;;  %v107_v4 = vand.u32 4294901760, %v26_v56  ;;  %v3733_v9 = vand.u32 4294901760, %v2692_v28 }
  0x10   :  { %v2267_v7 = vpack.c.bf16 %v321_v61, %v314_v57  ;;  %2248 = vmatprep.subr.bf16.mxu0 %v2746_v62  ;;  %v328_v8 = vand.u32 4294901760, %v327_v0  ;;  %v3730_v10 = vand.u32 4294901760, %v2705_v38  ;;  %v2769_v12 = vsub.f32 %v42_v42, %v155_v52  ;;  %v46_v57 = vld [vmem:[%s3718_s1 + $0xd8] sm:$0xff] }
  0x11   :  { %v335_v13 = vand.u32 4294901760, %v334_v2  ;;  %v2771_v16 = vpack.c.bf16 %v107_v4, %v104_v3  ;;  %v2773_v17 = vsub.f32 %v25_v55, %v104_v3  ;;  %v215_v18 = vsub.f32 %v2692_v28, %v3733_v9 }
  0x12   :  { %2268 = vmatprep.subr.bf16.mxu1 %v2267_v7  ;;  %v222_v19 = vsub.f32 %v2705_v38, %v3730_v10  ;;  %v158_v23 = vand.u32 4294901760, %v43_v5  ;;  %v161_v24 = vand.u32 4294901760, %v44_v6  ;;  %v3728_v33 = vand.u32 4294901760, %v2709_v40 }
  0x13   :  { %2270 = vmatpush3.bf16.msra.mxu1 %v2269_v1  ;;  %v2271_v30 = vpack.c.bf16 %v335_v13, %v328_v8  ;;  %2250 = vmatpush3.bf16.msra.mxu0 %v2771_v16  ;;  %v3727_v34 = vand.u32 4294901760, %v2715_v43  ;;  %v110_v37 = vand.u32 4294901760, %v27_v11  ;;  %v2787_v42 = vsub.f32 %v26_v56, %v107_v4  ;;  %v45_v56 = vld [vmem:[%s3718_s1 + $0xd0] sm:$0xff] }
  0x14   :  { %v216_v47 = vand.u32 4294901760, %v215_v18  ;;  %v223_v48 = vand.u32 4294901760, %v222_v19  ;;  %v2789_v49 = vpack.c.bf16 %v161_v24, %v158_v23  ;;  %v2791_v50 = vsub.f32 %v43_v5, %v158_v23  ;;  %v29_v1 = vld [vmem:[%s3718_s1 + $0x50] sm:$0xff]  ;;  %v30_v18 = vld [vmem:[%s3718_s1 + $0x58] sm:$0xff] }
  0x15   :  { %2272 = vmatprep.subr.bf16.mxu1 %v2271_v30  ;;  %v341_v51 = vsub.f32 %v2709_v40, %v3728_v33  ;;  %v348_v52 = vsub.f32 %v2715_v43, %v3727_v34  ;;  %v113_v55 = vand.u32 4294901760, %v28_v29  ;;  %v2806_v60 = vsub.f32 %v44_v6, %v161_v24 }
  0x16   :  { %v2273_v59 = vpack.c.bf16 %v223_v48, %v216_v47  ;;  %2252 = vmatprep.subr.bf16.mxu0 %v2789_v49  ;;  %v3725_v61 = vand.u32 4294901760, %v2720_v46  ;;  %v3724_v0 = vand.u32 4294901760, %v2744_v58  ;;  %v2815_v5 = vsub.f32 %v27_v11, %v110_v37 }
  0x17   :  { %v342_v2 = vand.u32 4294901760, %v341_v51  ;;  %v349_v3 = vand.u32 4294901760, %v348_v52  ;;  %v2813_v4 = vpack.c.bf16 %v113_v55, %v110_v37  ;;  %v164_v8 = vand.u32 4294901760, %v45_v56 }
  0x18   :  { %2274 = vmatpush3.bf16.msra.mxu1 %v2273_v59  ;;  %v229_v6 = vsub.f32 %v2720_v46, %v3725_v61  ;;  %v236_v7 = vsub.f32 %v2744_v58, %v3724_v0  ;;  %v167_v13 = vand.u32 4294901760, %v46_v57  ;;  %v3723_v11 = vand.u32 4294901760, %v2748_v63 }
  0x19   :  { %v2275_v19 = vpack.c.bf16 %v349_v3, %v342_v2  ;;  %2254 = vmatpush3.bf16.msra.mxu0 %v2813_v4  ;;  %v3722_v23 = vand.u32 4294901760, %v2769_v12  ;;  %v116_v24 = vand.u32 4294901760, %v29_v1  ;;  %v2829_v30 = vsub.f32 %v28_v29, %v113_v55  ;;  %v47_v29 = vld [vmem:[%s3718_s1 + $0xe0] sm:$0xff]  ;;  %v48_v55 = vld [vmem:[%s3718_s1 + $0xe8] sm:$0xff] }
  0x1a   :  { %v230_v37 = vand.u32 4294901760, %v229_v6  ;;  %v237_v47 = vand.u32 4294901760, %v236_v7  ;;  %v2831_v48 = vpack.c.bf16 %v167_v13, %v164_v8  ;;  %v2833_v51 = vsub.f32 %v45_v56, %v164_v8  ;;  %v31_v8 = vld [vmem:[%s3718_s1 + $0x60] sm:$0xff] }
  0x1b   :  { %2276 = vmatprep.subr.bf16.mxu1 %v2275_v19  ;;  %v355_v52 = vsub.f32 %v2748_v63, %v3723_v11  ;;  %v362_v59 = vsub.f32 %v2769_v12, %v3722_v23  ;;  %v119_v2 = vand.u32 4294901760, %v30_v18  ;;  %v2848_v56 = vsub.f32 %v46_v57, %v167_v13 }
  0x1c   :  { %v2277_v3 = vpack.c.bf16 %v237_v47, %v230_v37  ;;  %2256 = vmatprep.subr.bf16.mxu0 %v2831_v48  ;;  %v3726_v6 = vand.u32 4294901760, %v2773_v17  ;;  %v3729_v7 = vand.u32 4294901760, %v2787_v42  ;;  %v2857_v0 = vsub.f32 %v29_v1, %v116_v24 }
  0x1d   :  { %v356_v19 = vand.u32 4294901760, %v355_v52  ;;  %v363_v23 = vand.u32 4294901760, %v362_v59  ;;  %v2855_v11 = vpack.c.bf16 %v119_v2, %v116_v24  ;;  %v170_v37 = vand.u32 4294901760, %v47_v29  ;;  %v32_v52 = vld [vmem:[%s3718_s1 + $0x68] sm:$0xff] }
  0x1e   :  { %2278 = vmatpush3.bf16.msra.mxu1 %v2277_v3  ;;  %v243_v57 = vsub.f32 %v2773_v17, %v3726_v6  ;;  %v250_v13 = vsub.f32 %v2787_v42, %v3729_v7  ;;  %v173_v47 = vand.u32 4294901760, %v48_v55  ;;  %v3732_v1 = vand.u32 4294901760, %v2791_v50 }
  0x1f   :  { %3810 = vst [vmem:[#allocation3_spill] sm:$0xff] %v2855_v11  ;;  %v2279_v59 = vpack.c.bf16 %v363_v23, %v356_v19  ;;  %2258 = vmatpush3.bf16.msra.mxu0 %v2855_v11  ;;  %v3731_v24 = vand.u32 4294901760, %v2806_v60  ;;  %v122_v3 = vand.u32 4294901760, %v31_v8  ;;  %v2871_v61 = vsub.f32 %v30_v18, %v119_v2  ;;  %v49_v18 = vld [vmem:[%s3718_s1 + $0xf0] sm:$0xff]  ;;  %v50_v2 = vld [vmem:[%s3718_s1 + $0xf8] sm:$0xff] }
  0x20   :  { %v244_v6 = vand.u32 4294901760, %v243_v57  ;;  %v251_v34 = vand.u32 4294901760, %v250_v13  ;;  %v2873_v33 = vpack.c.bf16 %v173_v47, %v170_v37  ;;  %v2875_v7 = vsub.f32 %v47_v29, %v170_v37 }
  0x21   :  { %2280 = vmatprep.subr.bf16.mxu1 %v2279_v59  ;;  %v369_v23 = vsub.f32 %v2791_v50, %v3732_v1  ;;  %v376_v19 = vsub.f32 %v2806_v60, %v3731_v24  ;;  %v125_v10 = vand.u32 4294901760, %v32_v52  ;;  %v2890_v29 = vsub.f32 %v48_v55, %v173_v47  ;;  %v33_v59 = vld [vmem:[%s3718_s1 + $0x70] sm:$0xff] }
  0x22   :  { %3811 = vst [vmem:[#allocation4_spill] sm:$0xff] %v2873_v33  ;;  %v2281_v57 = vpack.c.bf16 %v251_v34, %v244_v6  ;;  %2260 = vmatprep.subr.bf16.mxu0 %v2873_v33  ;;  %v3736_v13 = vand.u32 4294901760, %v2815_v5  ;;  %v3739_v37 = vand.u32 4294901760, %v2829_v30  ;;  %v2899_v54 = vsub.f32 %v31_v8, %v122_v3 }
  0x23   :  { %v370_v24 = vand.u32 4294901760, %v369_v23  ;;  %v377_v1 = vand.u32 4294901760, %v376_v19  ;;  %v2897_v9 = vpack.c.bf16 %v125_v10, %v122_v3  ;;  %v176_v6 = vand.u32 4294901760, %v49_v18  ;;  %v34_v23 = vld [vmem:[%s3718_s1 + $0x78] sm:$0xff] }
  0x24   :  { %2282 = vmatpush3.bf16.msra.mxu1 %v2281_v57  ;;  %v257_v34 = vsub.f32 %v2815_v5, %v3736_v13  ;;  %v264_v55 = vsub.f32 %v2829_v30, %v3739_v37  ;;  %v179_v47 = vand.u32 4294901760, %v50_v2  ;;  %v3742_v8 = vand.u32 4294901760, %v2833_v51 }
  0x25   :  { %3812 = vst [vmem:[#allocation5_spill] sm:$0xff] %v2897_v9  ;;  %v2283_v19 = vpack.c.bf16 %v377_v1, %v370_v24  ;;  %2262 = vmatpush3.bf16.msra.mxu0 %v2897_v9  ;;  %v3741_v3 = vand.u32 4294901760, %v2848_v56  ;;  %v128_v57 = vand.u32 4294901760, %v33_v59  ;;  %v2913_v53 = vsub.f32 %v32_v52, %v125_v10  ;;  %v16_v10 = vld [vmem:[%s3719_s0 + $0x8] sm:$0xff] }
  0x26   :  { %v258_v13 = vand.u32 4294901760, %v257_v34  ;;  %v265_v36 = vand.u32 4294901760, %v264_v55  ;;  %v2915_v35 = vpack.c.bf16 %v179_v47, %v176_v6  ;;  %v2917_v37 = vsub.f32 %v49_v18, %v176_v6  ;;  %v15_v6 = vld [vmem:[%s3719_s0] sm:$0xff] }
  0x27   :  { %2284 = vmatprep.subr.bf16.mxu1 %v2283_v19  ;;  %v383_v1 = vsub.f32 %v2833_v51, %v3742_v8  ;;  %v390_v24 = vsub.f32 %v2848_v56, %v3741_v3  ;;  %v131_v44 = vand.u32 4294901760, %v34_v23  ;;  %v2929_v34 = vsub.f32 %v50_v2, %v179_v47 }
  0x28   :  { %3813 = vst [vmem:[#allocation6_spill] sm:$0xff] %v2915_v35  ;;  %v2285_v52 = vpack.c.bf16 %v265_v36, %v258_v13  ;;  %2264 = vmatprep.subr.bf16.mxu0 %v2915_v35  ;;  %v3746_v18 = vand.u32 4294901760, %v2857_v0  ;;  %v3747_v55 = vand.u32 4294901760, %v2871_v61  ;;  %v2938_v41 = vsub.f32 %v33_v59, %v128_v57 }
  0x29   :  { %v384_v19 = vand.u32 4294901760, %v383_v1  ;;  %v391_v3 = vand.u32 4294901760, %v390_v24  ;;  %v2936_v8 = vpack.c.bf16 %v131_v44, %v128_v57  ;;  %v2946_v13 = vand.u32 4294901760, %v16_v10 }
  0x2a   :  { %2286 = vmatpush3.bf16.msra.mxu1 %v2285_v52  ;;  %v271_v36 = vsub.f32 %v2857_v0, %v3746_v18  ;;  %v278_v2 = vsub.f32 %v2871_v61, %v3747_v55  ;;  %v3750_v47 = vand.u32 4294901760, %v2875_v7  ;;  %v3756_v1 = vand.u32 4294901760, %v2890_v29 }
  0x2b   :  { %3814 = vst [vmem:[#allocation7_spill] sm:$0xff] %v2936_v8  ;;  %3815 = vst [vmem:[#allocation8_spill] sm:$0xff] %v2946_v13  ;;  %v2287_v35 = vpack.c.bf16 %v391_v3, %v384_v19  ;;  %2266 = vmatpush3.bf16.msra.mxu0 %v2936_v8  ;;  %v2299_v59 = vpack.c.bf16 %v2697_v32, %v2695_v31  ;;  %v2953_v57 = vand.u32 4294901760, %v15_v6  ;;  %422 = vmatprep.mubr.f32.mxu1 %v2946_v13 }
  0x2c   :  { %v272_v24 = vand.u32 4294901760, %v271_v36  ;;  %v279_v52 = vand.u32 4294901760, %v278_v2  ;;  %v2956_v18 = vsub.f32 %v16_v10, %v2946_v13  ;;  %v397_v55 = vsub.f32 %v2875_v7, %v3750_v47 }
  0x2d   :  { %2288 = vmatprep.subr.bf16.mxu1 %v2287_v35  ;;  %v404_v3 = vsub.f32 %v2890_v29, %v3756_v1  ;;  %2300 = vmatprep.subr.bf16.mxu0 %v2299_v59  ;;  %v2966_v19 = vsub.f32 %v15_v6, %v2953_v57  ;;  %v3755_v36 = vand.u32 4294901760, %v2899_v54  ;;  %v3757_v10 = vand.u32 4294901760, %v2913_v53 }
  0x2e   :  { %v2970_v2 = vsub.f32 %v34_v23, %v131_v44  ;;  %v2289_v8 = vpack.c.bf16 %v279_v52, %v272_v24  ;;  %v3758_v47 = vand.u32 4294901760, %v2956_v18  ;;  %v398_v9 = vand.u32 4294901760, %v397_v55 }
  0x2f   :  { %v405_v13 = vand.u32 4294901760, %v404_v3  ;;  %v189_v35 = vand.u32 4294901760, %v2966_v19  ;;  %v285_v59 = vsub.f32 %v2899_v54, %v3755_v36  ;;  %v292_v6 = vsub.f32 %v2913_v53, %v3757_v10 }
  0x30   :  { %2290 = vmatpush3.bf16.msra.mxu1 %v2289_v8  ;;  %v184_v44 = vsub.f32 %v2956_v18, %v3758_v47  ;;  %v2301_v23 = vpack.c.bf16 %v2675_v21, %v2665_v15  ;;  %v3763_v55 = vand.u32 4294901760, %v2917_v37  ;;  %v3766_v24 = vand.u32 4294901760, %v2929_v34 }
  0x31   :  { %v2291_v52 = vpack.c.bf16 %v405_v13, %v398_v9  ;;  %v190_v3 = vsub.f32 %v2966_v19, %v189_v35  ;;  %v286_v36 = vand.u32 4294901760, %v285_v59  ;;  %v293_v1 = vand.u32 4294901760, %v292_v6 }
  0x32   :  { %v185_v10 = vand.u32 4294901760, %v184_v44  ;;  %v411_v8 = vsub.f32 %v2917_v37, %v3763_v55  ;;  %v418_v47 = vsub.f32 %v2929_v34, %v3766_v24  ;;  %v3765_v33 = vand.u32 4294901760, %v2938_v41 }
  0x33   :  { %2292 = vmatprep.subr.bf16.mxu1 %v2291_v52  ;;  %v191_v11 = vand.u32 4294901760, %v190_v3  ;;  %v2293_v9 = vpack.c.bf16 %v293_v1, %v286_v36  ;;  %v2303_v13 = vpack.c.bf16 %v2688_v26, %v2686_v25  ;;  %v3764_v59 = vand.u32 4294901760, %v2970_v2 }
  0x34   :  { %186 = vmatprep.mubr.f32.mxu0 %v185_v10  ;;  %v412_v6 = vand.u32 4294901760, %v411_v8  ;;  %v419_v44 = vand.u32 4294901760, %v418_v47  ;;  %v299_v55 = vsub.f32 %v2938_v41, %v3765_v33  ;;  %v2305_v3 = vpack.c.bf16 %v2705_v38, %v2692_v28 }
  0x35   :  { %192 = vmatmul.mubr.f32.vlgmr.msra.gmra.mrb[0].mxu0 %v191_v11  ;;  %2294 = vmatpush3.bf16.msra.mxu1 %v2293_v9  ;;  %v306_v52 = vsub.f32 %v2970_v2, %v3764_v59  ;;  %v2307_v10 = vpack.c.bf16 %v2715_v43, %v2709_v40  ;;  %v2309_v11 = vpack.c.bf16 %v2744_v58, %v2720_v46  ;;  %v3817_v9 = vand.u32 4294901760, %v2697_v32 }
  0x36   :  { %2302 = vmatpush3.bf16.msra.mxu0 %v2301_v23  ;;  %v2295_v1 = vpack.c.bf16 %v419_v44, %v412_v6  ;;  %v300_v36 = vand.u32 4294901760, %v299_v55  ;;  %559 = vmatprep.mubr.f32.mxu0 %v2956_v18  ;;  %v2311_v8 = vpack.c.bf16 %v2769_v12, %v2748_v63  ;;  %v3816_v55 = vand.u32 4294901760, %v2695_v31 }
  0x37   :  { %2304 = vmatprep.subr.bf16.mxu0 %v2303_v13  ;;  %v307_v47 = vand.u32 4294901760, %v306_v52  ;;  %v3818_v44 = vand.u32 4294901760, %v2665_v15  ;;  %v3819_v13 = vand.u32 4294901760, %v2675_v21  ;;  %v3820_v59 = vand.u32 4294901760, %v2686_v25 }
  0x38   :  { %2296 = vmatprep.subr.bf16.mxu1 %v2295_v1  ;;  %v2363_v6 = vpack.c.bf16 %v3817_v9, %v3816_v55  ;;  %v3821_v1 = vand.u32 4294901760, %v2688_v26  ;;  %v3822_v24 = vand.u32 4294901760, %v2692_v28  ;;  %v3824_v31 = vand.u32 4294901760, %v2709_v40 }
  0x39   :  { %v2297_v23 = vpack.c.bf16 %v307_v47, %v300_v36  ;;  %v2365_v52 = vpack.c.bf16 %v3819_v13, %v3818_v44  ;;  %v3823_v36 = vand.u32 4294901760, %v2705_v38  ;;  %v3825_v32 = vand.u32 4294901760, %v2715_v43  ;;  %v3839_v13 = vld [vmem:[#allocation8_spill] sm:$0xff] }
  0x3a   :  { %v2367_v33 = vpack.c.bf16 %v3821_v1, %v3820_v59  ;;  %2306 = vmatpush3.bf16.msra.mxu0 %v2305_v3  ;;  %v3826_v15 = vand.u32 4294901760, %v2720_v46  ;;  %v3827_v21 = vand.u32 4294901760, %v2744_v58  ;;  %v3828_v25 = vand.u32 4294901760, %v2748_v63  ;;  %v68_v1 = vld [vmem:[%s3718_s1 + $0x188] sm:$0xff] }
  0x3b   :  { %v2369_v47 = vpack.c.bf16 %v3823_v36, %v3822_v24  ;;  %v2371_v55 = vpack.c.bf16 %v3825_v32, %v3824_v31  ;;  %v3829_v26 = vand.u32 4294901760, %v2769_v12  ;;  %2298 = vmatpush3.bf16.msra.mxu1 %v2297_v23  ;;  %2308 = vmatprep.subr.bf16.mxu0 %v2307_v10  ;;  %v3830_v28 = vand.u32 4294901760, %v2773_v17  ;;  %v51_v36 = vld [vmem:[%s3718_s1 + $0x100] sm:$0xff]  ;;  %v3840_v31 = vld [vmem:[#allocation5_spill] sm:$0xff]  ;;  %v3841_v32 = vld [vmem:[#allocation6_spill] sm:$0xff] }
  0x3c   :  { %v3039_v9 = vpack.c.bf16 %v3827_v21, %v3826_v15  ;;  %v3831_v38 = vand.u32 4294901760, %v2787_v42  ;;  %v3832_v43 = vand.u32 4294901760, %v2791_v50  ;;  %v3833_v46 = vand.u32 4294901760, %v2806_v60  ;;  %2332 = vmatprep.subr.bf16.mxu1 %v2663_v14 }
  0x3d   :  { %v3045_v59 = vpack.c.bf16 %v3829_v26, %v3828_v25  ;;  %v3834_v63 = vand.u32 4294901760, %v2815_v5  ;;  %v3835_v12 = vand.u32 4294901760, %v2829_v30  ;;  %v2313_v3 = vpack.c.bf16 %v2787_v42, %v2773_v17  ;;  %v3842_v26 = vld [vmem:[#allocation7_spill] sm:$0xff] }
  0x3e   :  { %v3051_v40 = vpack.c.bf16 %v3831_v38, %v3830_v28  ;;  %v3057_v58 = vpack.c.bf16 %v3833_v46, %v3832_v43  ;;  %424 = vmatmul.mubr.f32.vlgmr.msra.gmra.mrb[0].mxu1 %v2953_v57  ;;  %2310 = vmatpush3.bf16.msra.mxu0 %v2309_v11  ;;  %v2315_v10 = vpack.c.bf16 %v2806_v60, %v2791_v50  ;;  %v3836_v23 = vand.u32 4294901760, %v2956_v18  ;;  %v3837_v18 = vld [vmem:[#allocation3_spill] sm:$0xff]  ;;  %v3838_v11 = vld [vmem:[#allocation4_spill] sm:$0xff]  ;;  %v69_v28 = vld [vmem:[%s3718_s1 + $0x190] sm:$0xff] }
  0x3f   :  { %v3063_v24 = vpack.c.bf16 %v3835_v12, %v3834_v63  ;;  %2334 = vmatpush3.bf16.msra.mxu1 %v2673_v20  ;;  %2312 = vmatprep.subr.bf16.mxu0 %v2311_v8  ;;  %v2317_v44 = vpack.c.bf16 %v2829_v30, %v2815_v5  ;;  %v2319_v17 = vpack.c.bf16 %v2848_v56, %v2833_v51  ;;  %v67_v8 = vld [vmem:[%s3718_s1 + $0x180] sm:$0xff]  ;;  %v999_v15 = vand.u32 4294901760, %v68_v1  ;;  %v70_v38 = vld [vmem:[%s3718_s1 + $0x198] sm:$0xff]  ;;  %v53_v43 = vld [vmem:[%s3718_s1 + $0x110] sm:$0xff] }
  0x40   :  { %2336 = vmatprep.subr.bf16.mxu1 %v2677_v22  ;;  %666 = vmatprep.mubr.f32.mxu1 %v3836_v23  ;;  %v2321_v42 = vpack.c.bf16 %v2871_v61, %v2857_v0  ;;  %v2323_v50 = vpack.c.bf16 %v2890_v29, %v2875_v7  ;;  %v2325_v60 = vpack.c.bf16 %v2913_v53, %v2899_v54  ;;  %v948_v21 = vand.u32 4294901760, %v51_v36 }
  0x41   :  { %v2327_v5 = vpack.c.bf16 %v2929_v34, %v2917_v37  ;;  %v2329_v30 = vpack.c.bf16 %v2970_v2, %v2938_v41  ;;  %v3844_v12 = vand.u32 4294901760, %v2848_v56  ;;  %v1005_v23 = vand.u32 4294901760, %v70_v38 }
  0x42   :  { %2314 = vmatpush3.bf16.msra.mxu0 %v2313_v3  ;;  %v3133_v46 = vsub.f32 %v51_v36, %v948_v21 }
  0x43   :  { %2338 = vmatpush3.bf16.msra.mxu1 %v2690_v27  ;;  %2316 = vmatprep.subr.bf16.mxu0 %v2315_v10  ;;  %v1002_v10 = vand.u32 4294901760, %v69_v28 }
  0x44   :  { %2340 = vmatprep.subr.bf16.mxu1 %v2707_v39 }
  0x45   :  { %v3200_v36 = vpack.c.bf16 %v1005_v23, %v1002_v10 }
  0x46   :  { %2318 = vmatpush3.bf16.msra.mxu0 %v2317_v44  ;;  %v3845_v44 = vand.u32 4294901760, %v2857_v0  ;;  %v3850_v0 = vand.u32 4294901760, %v2913_v53  ;;  %v18_v53 = vld [vmem:[%s3719_s0 + $0x18] sm:$0xff] }
  0x47   :  { %2342 = vmatpush3.bf16.msra.mxu1 %v2718_v45  ;;  %2320 = vmatprep.subr.bf16.mxu0 %v2319_v17  ;;  %v3846_v17 = vand.u32 4294901760, %v2871_v61  ;;  %v3849_v61 = vand.u32 4294901760, %v2899_v54  ;;  %3855 = vst [vmem:[#allocation3_spill] sm:$0xff] %v3200_v36 }
  0x48   :  { %2344 = vmatprep.subr.bf16.mxu1 %v2746_v62 }
  0x4a   :  { %2322 = vmatpush3.bf16.msra.mxu0 %v2321_v42  ;;  %v2385_v42 = vpack.c.bf16 %v3846_v17, %v3845_v44  ;;  %v3210_v44 = vand.u32 4294901760, %v18_v53 }
  0x4b   :  { %2346 = vmatpush3.bf16.msra.mxu1 %v2771_v16  ;;  %2324 = vmatprep.subr.bf16.mxu0 %v2323_v50  ;;  %v71_v50 = vld [vmem:[%s3718_s1 + $0x1a0] sm:$0xff] }
  0x4c   :  { %2348 = vmatprep.subr.bf16.mxu1 %v2789_v49  ;;  %3857 = vst [vmem:[#allocation8_spill] sm:$0xff] %v3210_v44 }
  0x4e   :  { %2326 = vmatpush3.bf16.msra.mxu0 %v2325_v60 }
  0x4f   :  { %2350 = vmatpush3.bf16.msra.mxu1 %v2813_v4  ;;  %2328 = vmatprep.subr.bf16.mxu0 %v2327_v5  ;;  %v3853_v5 = vand.u32 4294901760, %v2938_v41  ;;  %v55_v41 = vld [vmem:[%s3718_s1 + $0x120] sm:$0xff] }
  0x50   :  { %2352 = vmatprep.subr.bf16.mxu1 %v2831_v48 }
  0x52   :  { %2330 = vmatpush3.bf16.msra.mxu0 %v2329_v30  ;;  %v3854_v30 = vand.u32 4294901760, %v2970_v2  ;;  %v3775_v2 = vand.u32 4294901760, %v3133_v46 }
  0x53   :  { %2354 = vmatpush3.bf16.msra.mxu1 %v3837_v18  ;;  %2364 = vmatprep.subr.bf16.mxu0 %v2363_v6  ;;  %v52_v6 = vld [vmem:[%s3718_s1 + $0x108] sm:$0xff] }
  0x54   :  { %2356 = vmatprep.subr.bf16.mxu1 %v3838_v11  ;;  %v951_v25 = vand.u32 4294901760, %v52_v6 }
  0x55   :  { %562 = vmatmul.mubr.f32.vlgmr.msra.gmra.mrb[2].mxu0 %v2966_v19  ;;  %v3847_v19 = vand.u32 4294901760, %v2875_v7  ;;  %v3167_v7 = vpack.c.bf16 %v3850_v0, %v3849_v61 }
  0x56   :  { %2366 = vmatpush3.bf16.msra.mxu0 %v2365_v52  ;;  %836 = vmatprep.mubr.f32.mxu0 %v3839_v13  ;;  %v996_v52 = vand.u32 4294901760, %v67_v8  ;;  %v3135_v63 = vsub.f32 %v52_v6, %v951_v25  ;;  %v1008_v6 = vand.u32 4294901760, %v71_v50 }
  0x57   :  { %2358 = vmatpush3.bf16.msra.mxu1 %v3840_v31  ;;  %2368 = vmatprep.subr.bf16.mxu0 %v2367_v33 }
  0x58   :  { %2360 = vmatprep.subr.bf16.mxu1 %v3841_v32  ;;  %v3123_v33 = vsub.f32 %v67_v8, %v996_v52  ;;  %v3179_v8 = vpack.c.bf16 %v3854_v30, %v3853_v5  ;;  %v3186_v54 = vpack.c.bf16 %v999_v15, %v996_v52  ;;  %v3238_v17 = vsub.f32 %v71_v50, %v1008_v6  ;;  %v58_v50 = vld [vmem:[%s3718_s1 + $0x138] sm:$0xff] }
  0x5a   :  { %2370 = vmatpush3.bf16.msra.mxu0 %v2369_v47  ;;  %v54_v47 = vld [vmem:[%s3718_s1 + $0x118] sm:$0xff] }
  0x5b   :  { %2362 = vmatpush3.bf16.msra.mxu1 %v3842_v26  ;;  %2372 = vmatprep.subr.bf16.mxu0 %v2371_v55  ;;  %v3131_v55 = vsub.f32 %v68_v1, %v999_v15  ;;  %v957_v56 = vand.u32 4294901760, %v54_v47  ;;  %v3198_v1 = vpack.c.bf16 %v951_v25, %v948_v21  ;;  %v3204_v15 = vsub.f32 %v69_v28, %v1002_v10  ;;  %v74_v28 = vld [vmem:[%s3718_s1 + $0x1b8] sm:$0xff] }
  0x5c   :  { %2396 = vmatprep.subr.bf16.mxu1 %v2663_v14  ;;  %v3843_v14 = vand.u32 4294901760, %v2833_v51  ;;  %v954_v51 = vand.u32 4294901760, %v53_v43  ;;  %v960_v25 = vand.u32 4294901760, %v55_v41 }
  0x5e   :  { %670 = vmatmul.mubr.f32.vlgmr.msra.gmra.mrb[2].mxu1 %v189_v35  ;;  %2374 = vmatpush3.bf16.msra.mxu0 %v3039_v9  ;;  %v2383_v3 = vpack.c.bf16 %v3844_v12, %v3843_v14  ;;  %v3848_v35 = vand.u32 4294901760, %v2890_v29  ;;  %v3851_v29 = vand.u32 4294901760, %v2917_v37  ;;  %v3776_v37 = vand.u32 4294901760, %v3131_v55 }
  0x5f   :  { %2398 = vmatpush3.bf16.msra.mxu1 %v2673_v20  ;;  %2376 = vmatprep.subr.bf16.mxu0 %v3045_v59  ;;  %v72_v20 = vld [vmem:[%s3718_s1 + $0x1a8] sm:$0xff]  ;;  %v3852_v59 = vand.u32 4294901760, %v2929_v34  ;;  %v3206_v14 = vsub.f32 %v70_v38, %v1005_v23  ;;  %v3208_v12 = vpack.c.bf16 %v957_v56, %v954_v51  ;;  %v3224_v38 = vsub.f32 %v54_v47, %v957_v56 }
  0x60   :  { %v3154_v9 = vpack.c.bf16 %v3848_v35, %v3847_v19  ;;  %2400 = vmatprep.subr.bf16.mxu1 %v2677_v22  ;;  %940 = vmatprep.mubr.f32.mxu1 %v3839_v13  ;;  %v3779_v22 = vand.u32 4294901760, %v3123_v33  ;;  %v56_v34 = vld [vmem:[%s3718_s1 + $0x128] sm:$0xff]  ;;  %v3774_v13 = vand.u32 4294901760, %v3135_v63  ;;  %v1011_v52 = vand.u32 4294901760, %v72_v20 }
  0x61   :  { %v3173_v60 = vpack.c.bf16 %v3852_v59, %v3851_v29  ;;  %3856 = vst [vmem:[#allocation4_spill] sm:$0xff] %v3208_v12  ;;  %v3243_v19 = vsub.f32 %v18_v53, %v3210_v44  ;;  %v3770_v56 = vand.u32 4294901760, %v3204_v15  ;;  %v3769_v61 = vand.u32 4294901760, %v3206_v14 }
  0x62   :  { %2378 = vmatpush3.bf16.msra.mxu0 %v3051_v40  ;;  %v3213_v40 = vsub.f32 %v53_v43, %v954_v51  ;;  %v1175_v21 = vsub.f32 %v3123_v33, %v3779_v22  ;;  %v1063_v43 = vsub.f32 %v3133_v46, %v3775_v2  ;;  %v1070_v10 = vsub.f32 %v3135_v63, %v3774_v13 }
  0x63   :  { %2402 = vmatpush3.bf16.msra.mxu1 %v2690_v27  ;;  %2380 = vmatprep.subr.bf16.mxu0 %v3057_v58  ;;  %v963_v27 = vand.u32 4294901760, %v56_v34  ;;  %v73_v58 = vld [vmem:[%s3718_s1 + $0x1b0] sm:$0xff]  ;;  %v3236_v23 = vpack.c.bf16 %v1011_v52, %v1008_v6  ;;  %v3240_v47 = vsub.f32 %v72_v20, %v1011_v52  ;;  %v1017_v51 = vand.u32 4294901760, %v74_v28 }
  0x64   :  { %2404 = vmatprep.subr.bf16.mxu1 %v2707_v39  ;;  %v1182_v39 = vsub.f32 %v3131_v55, %v3776_v37  ;;  %v1014_v35 = vand.u32 4294901760, %v73_v58  ;;  %v1176_v20 = vand.u32 4294901760, %v1175_v21  ;;  %v1064_v59 = vand.u32 4294901760, %v1063_v43 }
  0x65   :  { %3858 = vst [vmem:[#allocation5_spill] sm:$0xff] %v3236_v23  ;;  %v3255_v0 = vpack.c.bf16 %v963_v27, %v960_v25  ;;  %v1071_v5 = vand.u32 4294901760, %v1070_v10  ;;  %v3767_v30 = vand.u32 4294901760, %v3213_v40  ;;  %v969_v6 = vand.u32 4294901760, %v58_v50 }
  0x66   :  { %2382 = vmatpush3.bf16.msra.mxu0 %v3063_v24  ;;  %v57_v24 = vld [vmem:[%s3718_s1 + $0x130] sm:$0xff]  ;;  %v1183_v29 = vand.u32 4294901760, %v1182_v39  ;;  %v3768_v52 = vand.u32 4294901760, %v3224_v38  ;;  %v3780_v21 = vand.u32 4294901760, %v3243_v19  ;;  %v3771_v39 = vand.u32 4294901760, %v3240_v47 }
  0x67   :  { %2406 = vmatpush3.bf16.msra.mxu1 %v2718_v45  ;;  %2384 = vmatprep.subr.bf16.mxu0 %v2383_v3  ;;  %3859 = vst [vmem:[#allocation6_spill] sm:$0xff] %v3255_v0  ;;  %v3257_v45 = vsub.f32 %v55_v41, %v960_v25  ;;  %v3259_v3 = vsub.f32 %v56_v34, %v963_v27  ;;  %v966_v53 = vand.u32 4294901760, %v57_v24 }
  0x68   :  { %2408 = vmatprep.subr.bf16.mxu1 %v2746_v62  ;;  %v75_v62 = vld [vmem:[%s3718_s1 + $0x1c0] sm:$0xff]  ;;  %v3269_v41 = vpack.c.bf16 %v1017_v51, %v1014_v35  ;;  %v1196_v34 = vsub.f32 %v3206_v14, %v3769_v61  ;;  %v3278_v25 = vsub.f32 %v73_v58, %v1014_v35  ;;  %v3280_v27 = vsub.f32 %v74_v28, %v1017_v51 }
  0x69   :  { %v3287_v43 = vpack.c.bf16 %v1183_v29, %v1176_v20  ;;  %v3289_v10 = vpack.c.bf16 %v1071_v5, %v1064_v59  ;;  %v1020_v58 = vand.u32 4294901760, %v75_v62  ;;  %v3295_v28 = vpack.c.bf16 %v969_v6, %v966_v53 }
  0x6a   :  { %2386 = vmatpush3.bf16.msra.mxu0 %v2385_v42  ;;  %3860 = vst [vmem:[#allocation7_spill] sm:$0xff] %v3269_v41  ;;  %v1189_v42 = vsub.f32 %v3204_v15, %v3770_v56  ;;  %v1084_v35 = vsub.f32 %v3224_v38, %v3768_v52  ;;  %v3772_v51 = vand.u32 4294901760, %v3257_v45  ;;  %v1046_v20 = vsub.f32 %v3243_v19, %v3780_v21  ;;  %v60_v56 = vld [vmem:[%s3718_s1 + $0x148] sm:$0xff] }
  0x6b   :  { %2410 = vmatpush3.bf16.msra.mxu1 %v2771_v16  ;;  %2388 = vmatprep.subr.bf16.mxu0 %v3154_v9  ;;  %v76_v16 = vld [vmem:[%s3718_s1 + $0x1c8] sm:$0xff]  ;;  %v3773_v9 = vand.u32 4294901760, %v3238_v17  ;;  %3861 = vst [vmem:[#allocation9_spill] sm:$0xff] %v3295_v28  ;;  %v1197_v59 = vand.u32 4294901760, %v1196_v34  ;;  %v3311_v52 = vsub.f32 %v57_v24, %v966_v53  ;;  %v3313_v61 = vsub.f32 %v58_v50, %v969_v6 }
  0x6c   :  { %2412 = vmatprep.subr.bf16.mxu1 %v2789_v49  ;;  %v1077_v49 = vsub.f32 %v3213_v40, %v3767_v30  ;;  %v1190_v29 = vand.u32 4294901760, %v1189_v42  ;;  %v1023_v5 = vand.u32 4294901760, %v76_v16  ;;  %v3777_v30 = vand.u32 4294901760, %v3259_v3 }
  0x6d   :  { %v3321_v34 = vsub.f32 %v75_v62, %v1020_v58  ;;  %v3781_v24 = vand.u32 4294901760, %v3280_v27  ;;  %v1085_v50 = vand.u32 4294901760, %v1084_v35  ;;  %v1091_v6 = vsub.f32 %v3257_v45, %v3772_v51  ;;  %v77_v62 = vld [vmem:[%s3718_s1 + $0x1d0] sm:$0xff] }
  0x6e   :  { %2390 = vmatpush3.bf16.msra.mxu0 %v3167_v7  ;;  %v59_v7 = vld [vmem:[%s3718_s1 + $0x140] sm:$0xff]  ;;  %v1078_v42 = vand.u32 4294901760, %v1077_v49  ;;  %v78_v49 = vld [vmem:[%s3718_s1 + $0x1d8] sm:$0xff]  ;;  %v3342_v35 = vpack.c.bf16 %v1023_v5, %v1020_v58  ;;  %v1098_v51 = vsub.f32 %v3259_v3, %v3777_v30  ;;  %v975_v37 = vand.u32 4294901760, %v60_v56 }
  0x6f   :  { %2414 = vmatpush3.bf16.msra.mxu1 %v2813_v4  ;;  %2392 = vmatprep.subr.bf16.mxu0 %v3173_v60  ;;  %v1203_v4 = vsub.f32 %v3238_v17, %v3773_v9  ;;  %v1210_v60 = vsub.f32 %v3240_v47, %v3771_v39  ;;  %v972_v53 = vand.u32 4294901760, %v59_v7  ;;  %v1047_v39 = vand.u32 4294901760, %v1046_v20  ;;  %v62_v58 = vld [vmem:[%s3718_s1 + $0x158] sm:$0xff] }
  0x70   :  { %2416 = vmatprep.subr.bf16.mxu1 %v2831_v48  ;;  %v3778_v48 = vand.u32 4294901760, %v3278_v25  ;;  %3862 = vst [vmem:[#allocation10_spill] sm:$0xff] %v3342_v35  ;;  %v3348_v9 = vsub.f32 %v76_v16, %v1023_v5  ;;  %v1026_v20 = vand.u32 4294901760, %v77_v62  ;;  %v1224_v16 = vsub.f32 %v3280_v27, %v3781_v24 }
  0x71   :  { %v1204_v13 = vand.u32 4294901760, %v1203_v4  ;;  %v1211_v2 = vand.u32 4294901760, %v1210_v60  ;;  %v3366_v5 = vsub.f32 %v59_v7, %v972_v53  ;;  %v1092_v4 = vand.u32 4294901760, %v1091_v6 }
  0x72   :  { %2394 = vmatpush3.bf16.msra.mxu0 %v3179_v8  ;;  %v3340_v8 = vpack.c.bf16 %v1197_v59, %v1190_v29  ;;  %v1029_v29 = vand.u32 4294901760, %v78_v49  ;;  %v3364_v59 = vpack.c.bf16 %v1085_v50, %v1078_v42  ;;  %v1099_v30 = vand.u32 4294901760, %v1098_v51  ;;  %v79_v42 = vld [vmem:[%s3718_s1 + $0x1e0] sm:$0xff] }
  0x73   :  { %2418 = vmatpush3.bf16.msra.mxu1 %v3837_v18  ;;  %2428 = vmatprep.subr.bf16.mxu0 %v3186_v54  ;;  %v61_v18 = vld [vmem:[%s3718_s1 + $0x150] sm:$0xff]  ;;  %v981_v22 = vand.u32 4294901760, %v62_v58  ;;  %v3376_v7 = vpack.c.bf16 %v1211_v2, %v1204_v13  ;;  %v3378_v50 = vpack.c.bf16 %v975_v37, %v972_v53  ;;  %v3782_v51 = vand.u32 4294901760, %v3321_v34 }
  0x74   :  { %2420 = vmatprep.subr.bf16.mxu1 %v3838_v11  ;;  %v1217_v11 = vsub.f32 %v3278_v25, %v3778_v48  ;;  %v978_v48 = vand.u32 4294901760, %v61_v18  ;;  %v3386_v6 = vpack.c.bf16 %v1029_v29, %v1026_v20  ;;  %v1225_v21 = vand.u32 4294901760, %v1224_v16 }
  0x75   :  { %838 = vmatmul.mubr.f32.vlgmr.msra.gmra.mrb[4].mxu0 %v2953_v57  ;;  %v3397_v2 = vsub.f32 %v78_v49, %v1029_v29  ;;  %v3867_v13 = vand.u32 4294901760, %v3311_v52  ;;  %v1032_v53 = vand.u32 4294901760, %v79_v42  ;;  %v3868_v60 = vand.u32 4294901760, %v3313_v61 }
  0x76   :  { %2430 = vmatpush3.bf16.msra.mxu0 %v3198_v1  ;;  %1048 = vmatprep.mubr.f32.mxu0 %v1047_v39  ;;  %v3380_v39 = vsub.f32 %v60_v56, %v975_v37  ;;  %3864 = vst [vmem:[#allocation12_spill] sm:$0xff] %v3386_v6  ;;  %v1218_v24 = vand.u32 4294901760, %v1217_v11  ;;  %v3395_v37 = vsub.f32 %v77_v62, %v1026_v20 }
  0x77   :  { %2422 = vmatpush3.bf16.msra.mxu1 %v3840_v31  ;;  %2432 = vmatprep.subr.bf16.mxu0 %v3200_v36  ;;  %v80_v31 = vld [vmem:[%s3718_s1 + $0x1e8] sm:$0xff]  ;;  %3866 = vst [vmem:[#allocation14_spill] sm:$0xff] %v3397_v2  ;;  %v1105_v56 = vsub.f32 %v3311_v52, %v3867_v13  ;;  %v3404_v11 = vpack.c.bf16 %v1099_v30, %v1092_v4  ;;  %v3874_v36 = vand.u32 4294901760, %v3397_v2 }
  0x78   :  { %2424 = vmatprep.subr.bf16.mxu1 %v3841_v32  ;;  %3863 = vst [vmem:[#allocation11_spill] sm:$0xff] %v3380_v39  ;;  %v3392_v32 = vld [vmem:[%s3718_s1 + $0x160] sm:$0xff]  ;;  %3865 = vst [vmem:[#allocation13_spill] sm:$0xff] %v3395_v37  ;;  %v3406_v16 = vpack.c.bf16 %v981_v22, %v978_v48  ;;  %v1112_v62 = vsub.f32 %v3313_v61, %v3868_v60  ;;  %v1035_v20 = vand.u32 4294901760, %v80_v31  ;;  %v3422_v30 = vld [vmem:[%s3718_s1 + $0x168] sm:$0xff]  ;;  %v3869_v60 = vand.u32 4294901760, %v3348_v9 }
  0x79   :  { %v3412_v49 = vsub.f32 %v61_v18, %v978_v48  ;;  %v3414_v29 = vsub.f32 %v62_v58, %v981_v22  ;;  %v2471_v13 = vpack.c.bf16 %v1225_v21, %v1218_v24  ;;  %v3433_v18 = vld [vmem:[%s3718_s1 + $0x1f0] sm:$0xff]  ;;  %v3438_v58 = vld [vmem:[%s3718_s1 + $0x1f8] sm:$0xff]  ;;  %v1106_v21 = vand.u32 4294901760, %v1105_v56 }
  0x7a   :  { %2434 = vmatpush3.bf16.msra.mxu0 %v3208_v12  ;;  %v3442_v24 = vsub.f32 %v79_v42, %v1032_v53  ;;  %v17_v22 = vld [vmem:[%s3719_s0 + $0x10] sm:$0xff]  ;;  %v1113_v48 = vand.u32 4294901760, %v1112_v62  ;;  %v3451_v4 = vpack.c.bf16 %v1035_v20, %v1032_v53  ;;  %v987_v42 = vand.u32 4294901760, %v3422_v30 }
  0x7b   :  { %2426 = vmatpush3.bf16.msra.mxu1 %v3842_v26  ;;  %2436 = vmatprep.subr.bf16.mxu0 %v3236_v23  ;;  %v1231_v26 = vsub.f32 %v3321_v34, %v3782_v51  ;;  %v3870_v51 = vand.u32 4294901760, %v3392_v32  ;;  %v3467_v53 = vld [vmem:[%s3718_s1 + $0x170] sm:$0xff]  ;;  %v3873_v23 = vand.u32 4294901760, %v3395_v37 }
  0x7c   :  { %2460 = vmatprep.subr.bf16.mxu1 %v3287_v43  ;;  %v1238_v43 = vsub.f32 %v3348_v9, %v3869_v60 }
  0x7d   :  { %v1232_v56 = vand.u32 4294901760, %v1231_v26  ;;  %v3460_v60 = vsub.f32 %v3392_v32, %v3870_v51  ;;  %v3871_v51 = vand.u32 4294901760, %v3366_v5  ;;  %v1245_v12 = vsub.f32 %v3395_v37, %v3873_v23 }
  0x7e   :  { %942 = vmatmul.mubr.f32.vlgmr.msra.gmra.mrb[4].mxu1 %v2953_v57  ;;  %2438 = vmatpush3.bf16.msra.mxu0 %v3255_v0  ;;  %v3453_v57 = vsub.f32 %v80_v31, %v1035_v20  ;;  %v1038_v0 = vand.u32 4294901760, %v3433_v18  ;;  %v3472_v31 = vld [vmem:[%s3718_s1 + $0x178] sm:$0xff]  ;;  %v3872_v20 = vand.u32 4294901760, %v3380_v39 }
  0x7f   :  { %2462 = vmatpush3.bf16.msra.mxu1 %v3289_v10  ;;  %2440 = vmatprep.subr.bf16.mxu0 %v3269_v41  ;;  %v1041_v10 = vand.u32 4294901760, %v3438_v58  ;;  %v1119_v62 = vsub.f32 %v3366_v5, %v3871_v51  ;;  %v3481_v41 = vand.u32 4294901760, %v17_v22  ;;  %v993_v23 = vand.u32 4294901760, %v3472_v31 }
  0x80   :  { %2464 = vmatprep.subr.bf16.mxu1 %v3340_v8  ;;  %1284 = vmatprep.mubr.f32.mxu1 %v3210_v44  ;;  %v1239_v8 = vand.u32 4294901760, %v1238_v43  ;;  %v1126_v26 = vsub.f32 %v3380_v39, %v3872_v20  ;;  %v1252_v43 = vsub.f32 %v3397_v2, %v3874_v36  ;;  %v2473_v20 = vpack.c.bf16 %v1113_v48, %v1106_v21 }
  0x81   :  { %v3495_v39 = vsub.f32 %v3422_v30, %v987_v42  ;;  %v3501_v36 = vsub.f32 %v3433_v18, %v1038_v0  ;;  %v3504_v44 = vsub.f32 %v3438_v58, %v1041_v10  ;;  %v3807_v51 = vand.u32 4294901760, %v3453_v57 }
  0x82   :  { %2442 = vmatpush3.bf16.msra.mxu0 %v3295_v28  ;;  %v990_v28 = vand.u32 4294901760, %v3467_v53  ;;  %v2475_v48 = vpack.c.bf16 %v1239_v8, %v1232_v56  ;;  %v1120_v21 = vand.u32 4294901760, %v1119_v62  ;;  %v1127_v30 = vand.u32 4294901760, %v1126_v26 }
  0x83   :  { %2466 = vmatpush3.bf16.msra.mxu1 %v3364_v59  ;;  %2444 = vmatprep.subr.bf16.mxu0 %v3342_v35  ;;  %v3509_v35 = vsub.f32 %v17_v22, %v3481_v41  ;;  %v1246_v2 = vand.u32 4294901760, %v1245_v12  ;;  %v3875_v18 = vand.u32 4294901760, %v3412_v49  ;;  %v3876_v58 = vand.u32 4294901760, %v3414_v29 }
  0x84   :  { %2468 = vmatprep.subr.bf16.mxu1 %v3376_v7  ;;  %v1253_v7 = vand.u32 4294901760, %v1252_v43  ;;  %v3521_v56 = vsub.f32 %v3467_v53, %v990_v28  ;;  %v3524_v22 = vsub.f32 %v3472_v31, %v993_v23  ;;  %v3877_v62 = vand.u32 4294901760, %v3442_v24 }
  0x85   :  { %v1133_v37 = vsub.f32 %v3412_v49, %v3875_v18  ;;  %v1140_v59 = vsub.f32 %v3414_v29, %v3876_v58  ;;  %v1272_v43 = vand.u32 4294901760, %v3501_v36  ;;  %v3878_v31 = vand.u32 4294901760, %v3392_v32 }
  0x86   :  { %2446 = vmatpush3.bf16.msra.mxu0 %v3378_v50  ;;  %v1259_v26 = vsub.f32 %v3442_v24, %v3877_v62  ;;  %v3540_v58 = vpack.c.bf16 %v1041_v10, %v1038_v0  ;;  %v2477_v8 = vpack.c.bf16 %v1127_v30, %v1120_v21  ;;  %v2479_v62 = vpack.c.bf16 %v1253_v7, %v1246_v2 }
  0x87   :  { %2470 = vmatpush3.bf16.msra.mxu1 %v3404_v11  ;;  %2448 = vmatprep.subr.bf16.mxu0 %v3386_v6  ;;  %v1266_v11 = vsub.f32 %v3453_v57, %v3807_v51  ;;  %v3538_v18 = vpack.c.bf16 %v987_v42, %v3878_v31  ;;  %v1134_v12 = vand.u32 4294901760, %v1133_v37  ;;  %v1141_v6 = vand.u32 4294901760, %v1140_v59 }
  0x88   :  { %2472 = vmatprep.subr.bf16.mxu1 %v2471_v13  ;;  %v1051_v13 = vand.u32 4294901760, %v3509_v35  ;;  %v3879_v51 = vand.u32 4294901760, %v3460_v60  ;;  %v3880_v32 = vand.u32 4294901760, %v3495_v39  ;;  %v3808_v42 = vand.u32 4294901760, %v3521_v56 }
  0x89   :  { %v3809_v10 = vand.u32 4294901760, %v3524_v22  ;;  %v1260_v21 = vand.u32 4294901760, %v1259_v26  ;;  %v1267_v2 = vand.u32 4294901760, %v1266_v11  ;;  %v1273_v37 = vsub.f32 %v3501_v36, %v1272_v43 }
  0x8a   :  { %2450 = vmatpush3.bf16.msra.mxu0 %v3406_v16  ;;  %v1147_v53 = vsub.f32 %v3460_v60, %v3879_v51  ;;  %v1154_v0 = vsub.f32 %v3495_v39, %v3880_v32  ;;  %v1052_v51 = vsub.f32 %v3509_v35, %v1051_v13  ;;  %v3563_v30 = vpack.c.bf16 %v993_v23, %v990_v28 }
  0x8b   :  { %2474 = vmatpush3.bf16.msra.mxu1 %v2473_v20  ;;  %2452 = vmatprep.subr.bf16.mxu0 %v3451_v4  ;;  %v3881_v20 = vand.u32 4294901760, %v3504_v44  ;;  %v2481_v7 = vpack.c.bf16 %v1141_v6, %v1134_v12  ;;  %v1161_v31 = vsub.f32 %v3521_v56, %v3808_v42  ;;  %v1168_v32 = vsub.f32 %v3524_v22, %v3809_v10 }
  0x8c   :  { %2476 = vmatprep.subr.bf16.mxu1 %v2475_v48  ;;  %v2491_v48 = vpack.c.bf16 %v3131_v55, %v3123_v33  ;;  %v1148_v26 = vand.u32 4294901760, %v1147_v53  ;;  %v1155_v11 = vand.u32 4294901760, %v1154_v0  ;;  %v2483_v28 = vpack.c.bf16 %v1267_v2, %v1260_v21 }
  0x8d   :  { %v1280_v59 = vsub.f32 %v3504_v44, %v3881_v20  ;;  %v1274_v23 = vand.u32 4294901760, %v1273_v37  ;;  %v1053_v12 = vand.u32 4294901760, %v1052_v51  ;;  %v2495_v0 = vpack.c.bf16 %v3206_v14, %v3204_v15  ;;  %v3882_v51 = vld [vmem:[#allocation3_spill] sm:$0xff] }
  0x8e   :  { %2454 = vmatpush3.bf16.msra.mxu0 %v3538_v18  ;;  %v2485_v53 = vpack.c.bf16 %v1155_v11, %v1148_v26  ;;  %v1162_v20 = vand.u32 4294901760, %v1161_v31  ;;  %v1169_v42 = vand.u32 4294901760, %v1168_v32  ;;  %v2499_v2 = vpack.c.bf16 %v3240_v47, %v3238_v17  ;;  %v3885_v11 = vld [vmem:[#allocation4_spill] sm:$0xff]  ;;  %v3886_v31 = vld [vmem:[#allocation13_spill] sm:$0xff]  ;;  %v3887_v32 = vld [vmem:[#allocation14_spill] sm:$0xff] }
  0x8f   :  { %2478 = vmatpush3.bf16.msra.mxu1 %v2477_v8  ;;  %2456 = vmatprep.subr.bf16.mxu0 %v3540_v58  ;;  %v1281_v6 = vand.u32 4294901760, %v1280_v59  ;;  %v2493_v8 = vpack.c.bf16 %v3135_v63, %v3133_v46  ;;  %v2501_v37 = vpack.c.bf16 %v3259_v3, %v3257_v45  ;;  %v2503_v59 = vpack.c.bf16 %v3280_v27, %v3278_v25 }
  0x90   :  { %2480 = vmatprep.subr.bf16.mxu1 %v2479_v62  ;;  %v2497_v62 = vpack.c.bf16 %v3224_v38, %v3213_v40  ;;  %v2489_v21 = vpack.c.bf16 %v1169_v42, %v1162_v20  ;;  %v2505_v42 = vpack.c.bf16 %v3313_v61, %v3311_v52  ;;  %v2519_v20 = vpack.c.bf16 %v3504_v44, %v3501_v36 }
  0x91   :  { %v2487_v10 = vpack.c.bf16 %v1281_v6, %v1274_v23  ;;  %v3888_v23 = vld [vmem:[#allocation5_spill] sm:$0xff]  ;;  %v2513_v6 = vpack.c.bf16 %v3414_v29, %v3412_v49 }
  0x92   :  { %2458 = vmatpush3.bf16.msra.mxu0 %v3563_v30 }
  0x93   :  { %2482 = vmatpush3.bf16.msra.mxu1 %v2481_v7  ;;  %2492 = vmatprep.subr.bf16.mxu0 %v2491_v48  ;;  %v3883_v7 = vand.u32 4294901760, %v3243_v19  ;;  %v3884_v48 = vld [vmem:[#allocation11_spill] sm:$0xff] }
  0x94   :  { %2484 = vmatprep.subr.bf16.mxu1 %v2483_v28  ;;  %v2509_v26 = vpack.c.bf16 %v3884_v48, %v3366_v5  ;;  %v2511_v28 = vpack.c.bf16 %v3887_v32, %v3886_v31 }
  0x95   :  { %1054 = vmatmul.mubr.f32.vlgmr.msra.gmra.mrb[6].mxu0 %v1053_v12  ;;  %v3889_v12 = vld [vmem:[#allocation6_spill] sm:$0xff] }
  0x96   :  { %2494 = vmatpush3.bf16.msra.mxu0 %v2493_v8  ;;  %1421 = vmatprep.mubr.f32.mxu0 %v3243_v19  ;;  %v2515_v19 = vpack.c.bf16 %v3453_v57, %v3442_v24  ;;  %v3890_v8 = vld [vmem:[#allocation7_spill] sm:$0xff] }
  0x97   :  { %2486 = vmatpush3.bf16.msra.mxu1 %v2485_v53  ;;  %2496 = vmatprep.subr.bf16.mxu0 %v2495_v0  ;;  %v2517_v53 = vpack.c.bf16 %v3495_v39, %v3460_v60  ;;  %v3891_v0 = vld [vmem:[#allocation9_spill] sm:$0xff] }
  0x98   :  { %2488 = vmatprep.subr.bf16.mxu1 %v2487_v10  ;;  %v2507_v10 = vpack.c.bf16 %v3348_v9, %v3321_v34 }
  0x9a   :  { %2498 = vmatpush3.bf16.msra.mxu0 %v2497_v62  ;;  %v3892_v62 = vld [vmem:[#allocation10_spill] sm:$0xff] }
  0x9b   :  { %2490 = vmatpush3.bf16.msra.mxu1 %v2489_v21  ;;  %2500 = vmatprep.subr.bf16.mxu0 %v2499_v2  ;;  %v2521_v21 = vpack.c.bf16 %v3524_v22, %v3521_v56  ;;  %v3893_v2 = vand.u32 4294901760, %v3123_v33  ;;  %v3900_v33 = vand.u32 4294901760, %v3213_v40  ;;  %v3906_v40 = vand.u32 4294901760, %v3259_v3 }
  0x9c   :  { %2524 = vmatprep.subr.bf16.mxu1 %v3186_v54  ;;  %v3911_v3 = vand.u32 4294901760, %v3321_v34 }
  0x9e   :  { %1286 = vmatmul.mubr.f32.vlgmr.msra.gmra.mrb[6].mxu1 %v3481_v41  ;;  %2502 = vmatpush3.bf16.msra.mxu0 %v2501_v37  ;;  %v3894_v37 = vand.u32 4294901760, %v3131_v55  ;;  %v3901_v55 = vand.u32 4294901760, %v3224_v38  ;;  %v3907_v38 = vand.u32 4294901760, %v3278_v25  ;;  %v3912_v25 = vand.u32 4294901760, %v3348_v9 }
  0x9f   :  { %2526 = vmatpush3.bf16.msra.mxu1 %v3198_v1  ;;  %2504 = vmatprep.subr.bf16.mxu0 %v2503_v59  ;;  %v3917_v9 = vand.u32 4294901760, %v3412_v49  ;;  %v3923_v49 = vand.u32 4294901760, %v3504_v44 }
  0xa0   :  { %2528 = vmatprep.subr.bf16.mxu1 %v3882_v51  ;;  %1528 = vmatprep.mubr.f32.mxu1 %v3883_v7  ;;  %v2555_v59 = vpack.c.bf16 %v3894_v37, %v3893_v2  ;;  %v3897_v7 = vand.u32 4294901760, %v3135_v63  ;;  %v3902_v63 = vld [vmem:[#allocation8_spill] sm:$0xff]  ;;  %v3908_v2 = vand.u32 4294901760, %v3280_v27  ;;  %v2571_v27 = vpack.c.bf16 %v3912_v25, %v3911_v3 }
  0xa2   :  { %2506 = vmatpush3.bf16.msra.mxu0 %v2505_v42  ;;  %v3895_v42 = vld [vmem:[#allocation12_spill] sm:$0xff]  ;;  %v2567_v37 = vpack.c.bf16 %v3908_v2, %v3907_v38 }
  0xa3   :  { %2530 = vmatpush3.bf16.msra.mxu1 %v3885_v11  ;;  %2508 = vmatprep.subr.bf16.mxu0 %v2507_v10  ;;  %v3896_v10 = vand.u32 4294901760, %v3133_v46  ;;  %v2561_v46 = vpack.c.bf16 %v3901_v55, %v3900_v33 }
  0xa4   :  { %2532 = vmatprep.subr.bf16.mxu1 %v3888_v23 }
  0xa6   :  { %2510 = vmatpush3.bf16.msra.mxu0 %v2509_v26  ;;  %v2557_v26 = vpack.c.bf16 %v3897_v7, %v3896_v10 }
  0xa7   :  { %2534 = vmatpush3.bf16.msra.mxu1 %v3889_v12  ;;  %2512 = vmatprep.subr.bf16.mxu0 %v2511_v28  ;;  %v3898_v28 = vand.u32 4294901760, %v3204_v15  ;;  %v3903_v15 = vand.u32 4294901760, %v3238_v17  ;;  %v3909_v17 = vand.u32 4294901760, %v3311_v52  ;;  %v3914_v52 = vand.u32 4294901760, %v3884_v48 }
  0xa8   :  { %2536 = vmatprep.subr.bf16.mxu1 %v3890_v8  ;;  %v3920_v48 = vand.u32 4294901760, %v3453_v57  ;;  %v3925_v57 = vand.u32 4294901760, %v3524_v22 }
  0xaa   :  { %2514 = vmatpush3.bf16.msra.mxu0 %v2513_v6  ;;  %v3899_v6 = vand.u32 4294901760, %v3206_v14  ;;  %v3904_v14 = vand.u32 4294901760, %v3240_v47  ;;  %v3910_v47 = vand.u32 4294901760, %v3313_v61  ;;  %v3916_v61 = vand.u32 4294901760, %v3887_v32 }
  0xab   :  { %2538 = vmatpush3.bf16.msra.mxu1 %v3891_v0  ;;  %2516 = vmatprep.subr.bf16.mxu0 %v2515_v19  ;;  %v3922_v32 = vand.u32 4294901760, %v3495_v39 }
  0xac   :  { %2540 = vmatprep.subr.bf16.mxu1 %v3892_v62  ;;  %v2559_v19 = vpack.c.bf16 %v3899_v6, %v3898_v28 }
  0xae   :  { %2518 = vmatpush3.bf16.msra.mxu0 %v2517_v53  ;;  %v2563_v53 = vpack.c.bf16 %v3904_v14, %v3903_v15 }
  0xaf   :  { %2542 = vmatpush3.bf16.msra.mxu1 %v3378_v50  ;;  %2520 = vmatprep.subr.bf16.mxu0 %v2519_v20  ;;  %v3905_v20 = vand.u32 4294901760, %v3257_v45  ;;  %v2569_v45 = vpack.c.bf16 %v3910_v47, %v3909_v17 }
  0xb0   :  { %2544 = vmatprep.subr.bf16.mxu1 %v3895_v42 }
  0xb2   :  { %2522 = vmatpush3.bf16.msra.mxu0 %v2521_v21  ;;  %v2565_v21 = vpack.c.bf16 %v3906_v40, %v3905_v20 }
  0xb3   :  { %2546 = vmatpush3.bf16.msra.mxu1 %v3406_v16  ;;  %2556 = vmatprep.subr.bf16.mxu0 %v2555_v59 }
  0xb4   :  { %2548 = vmatprep.subr.bf16.mxu1 %v3451_v4 }
  0xb5   :  { %1424 = vmatmul.mubr.f32.vlgmr.msra.gmra.mrb[8].mxu0 %v3509_v35 }
  0xb6   :  { %2558 = vmatpush3.bf16.msra.mxu0 %v2557_v26  ;;  %1698 = vmatprep.mubr.f32.mxu0 %v3902_v63 }
  0xb7   :  { %2550 = vmatpush3.bf16.msra.mxu1 %v3538_v18  ;;  %2560 = vmatprep.subr.bf16.mxu0 %v2559_v19 }
  0xb8   :  { %2552 = vmatprep.subr.bf16.mxu1 %v3540_v58 }
  0xba   :  { %2562 = vmatpush3.bf16.msra.mxu0 %v2561_v46 }
  0xbb   :  { %2554 = vmatpush3.bf16.msra.mxu1 %v3563_v30  ;;  %2564 = vmatprep.subr.bf16.mxu0 %v2563_v53 }
  0xbc   :  { %2588 = vmatprep.subr.bf16.mxu1 %v3186_v54  ;;  %v3913_v54 = vand.u32 4294901760, %v3366_v5  ;;  %v3919_v5 = vand.u32 4294901760, %v3442_v24  ;;  %v3924_v24 = vand.u32 4294901760, %v3521_v56 }
  0xbe   :  { %1532 = vmatmul.mubr.f32.vlgmr.msra.gmra.mrb[8].mxu1 %v1051_v13  ;;  %2566 = vmatpush3.bf16.msra.mxu0 %v2565_v21  ;;  %v2573_v35 = vpack.c.bf16 %v3914_v52, %v3913_v54  ;;  %v3918_v13 = vand.u32 4294901760, %v3414_v29  ;;  %v2583_v29 = vpack.c.bf16 %v3923_v49, %v1272_v43 }
  0xbf   :  { %2590 = vmatpush3.bf16.msra.mxu1 %v3198_v1  ;;  %2568 = vmatprep.subr.bf16.mxu0 %v2567_v37  ;;  %v3915_v1 = vand.u32 4294901760, %v3886_v31  ;;  %v3921_v31 = vand.u32 4294901760, %v3460_v60  ;;  %v84_v60 = vstv %s3720_s2 }
  0xc0   :  { %2592 = vmatprep.subr.bf16.mxu1 %v3882_v51  ;;  %1802 = vmatprep.mubr.f32.mxu1 %v3902_v63  ;;  %v2577_v51 = vpack.c.bf16 %v3918_v13, %v3917_v9 }
  0xc1   :  { %v2575_v34 = vpack.c.bf16 %v3916_v61, %v3915_v1 }
  0xc2   :  { %2570 = vmatpush3.bf16.msra.mxu0 %v2569_v45 }
  0xc3   :  { %2594 = vmatpush3.bf16.msra.mxu1 %v3885_v11  ;;  %2572 = vmatprep.subr.bf16.mxu0 %v2571_v27  ;;  %v2579_v11 = vpack.c.bf16 %v3920_v48, %v3919_v5 }
  0xc4   :  { %2596 = vmatprep.subr.bf16.mxu1 %v3888_v23  ;;  %v2581_v23 = vpack.c.bf16 %v3922_v32, %v3921_v31 }
  0xc6   :  { %2574 = vmatpush3.bf16.msra.mxu0 %v2573_v35 }
  0xc7   :  { %2598 = vmatpush3.bf16.msra.mxu1 %v3889_v12  ;;  %2576 = vmatprep.subr.bf16.mxu0 %v2575_v34  ;;  %v2585_v12 = vpack.c.bf16 %v3925_v57, %v3924_v24 }
  0xc8   :  { %2600 = vmatprep.subr.bf16.mxu1 %v3890_v8 }
  0xca   :  { %2578 = vmatpush3.bf16.msra.mxu0 %v2577_v51 }
  0xcb   :  { %2602 = vmatpush3.bf16.msra.mxu1 %v3891_v0  ;;  %2580 = vmatprep.subr.bf16.mxu0 %v2579_v11 }
  0xcc   :  { %2604 = vmatprep.subr.bf16.mxu1 %v3892_v62 }
  0xce   :  { %2582 = vmatpush3.bf16.msra.mxu0 %v2581_v23 }
  0xcf   :  { %2606 = vmatpush3.bf16.msra.mxu1 %v3378_v50  ;;  %2584 = vmatprep.subr.bf16.mxu0 %v2583_v29 }
  0xd0   :  { %2608 = vmatprep.subr.bf16.mxu1 %v3895_v42 }
  0xd2   :  { %2586 = vmatpush3.bf16.msra.mxu0 %v2585_v12 }
  0xd3   :  { %2610 = vmatpush3.bf16.msra.mxu1 %v3406_v16 }
  0xd4   :  { %2612 = vmatprep.subr.bf16.mxu1 %v3451_v4 }
  0xd5   :  { %1700 = vmatmul.mubr.f32.vlgmr.msra.gmra.mrb[10].mxu0 %v3481_v41 }
  0xd7   :  { %2614 = vmatpush3.bf16.msra.mxu1 %v3538_v18 }
  0xd8   :  { %2616 = vmatprep.subr.bf16.mxu1 %v3540_v58 }
  0xdb   :  { %2618 = vmatpush3.bf16.msra.mxu1 %v3563_v30 }
  0xde   :  { %1804 = vmatmul.mubr.f32.vlgmr.msra.gmra.mrb[10].mxu1 %v3481_v41 }
 0x108   :  { %v1847_v44 = vpop.f32.mrb[0].mxu0 }
 0x109   :  { %v1848_v50 = vpop.f32.mrb[1].mxu0 }
 0x10a   :  { %v1849_v39 = vadd.f32 %v1848_v50, %v1847_v44 }
 0x10c   :  { %v194_v16 = vadd.f32 %v1849_v39, %v84_v60 }
 0x111   :  { %v1882_v36 = vpop.f32.mrb[0].mxu1 }
 0x112   :  { %v1883_v4 = vpop.f32.mrb[1].mxu1 }
 0x113   :  { %v1884_v56 = vadd.f32 %v1883_v4, %v1882_v36 }
 0x115   :  { %v426_v22 = vadd.f32 %v1884_v56, %v194_v16 }
 0x128   :  { %v1917_v43 = vpop.f32.mrb[2].mxu0 }
 0x129   :  { %v1918_v18 = vpop.f32.mrb[3].mxu0 }
 0x12a   :  { %v1919_v8 = vadd.f32 %v1918_v18, %v1917_v43 }
 0x12c   :  { %v564_v58 = vadd.f32 %v1919_v8, %v426_v22 }
 0x131   :  { %v1952_v0 = vpop.f32.mrb[2].mxu1 }
 0x132   :  { %v1953_v30 = vpop.f32.mrb[3].mxu1 }
 0x133   :  { %v1954_v62 = vadd.f32 %v1953_v30, %v1952_v0 }
 0x135   :  { %v672_v41 = vadd.f32 %v1954_v62, %v564_v58 }
 0x148   :  { %v1987_v59 = vpop.f32.mrb[4].mxu0 }
 0x149   :  { %v1988_v42 = vpop.f32.mrb[5].mxu0 }
 0x14a   :  { %v1989_v10 = vadd.f32 %v1988_v42, %v1987_v59 }
 0x14c   :  { %v840_v7 = vadd.f32 %v1989_v10, %v672_v41 }
 0x151   :  { %v2022_v26 = vpop.f32.mrb[4].mxu1 }
 0x152   :  { %v2023_v28 = vpop.f32.mrb[5].mxu1 }
 0x153   :  { %v2024_v6 = vadd.f32 %v2023_v28, %v2022_v26 }
 0x155   :  { %v944_v19 = vadd.f32 %v2024_v6, %v840_v7 }
 0x168   :  { %v2057_v33 = vpop.f32.mrb[6].mxu0 }
 0x169   :  { %v2058_v55 = vpop.f32.mrb[7].mxu0 }
 0x16a   :  { %v2059_v46 = vadd.f32 %v2058_v55, %v2057_v33 }
 0x16c   :  { %v1056_v63 = vadd.f32 %v2059_v46, %v944_v19 }
 0x171   :  { %v2092_v15 = vpop.f32.mrb[6].mxu1 }
 0x172   :  { %v2093_v14 = vpop.f32.mrb[7].mxu1 }
 0x173   :  { %v2094_v53 = vadd.f32 %v2093_v14, %v2092_v15 }
 0x175   :  { %v1288_v20 = vadd.f32 %v2094_v53, %v1056_v63 }
 0x188   :  { %v2127_v40 = vpop.f32.mrb[8].mxu0 }
 0x189   :  { %v2128_v21 = vpop.f32.mrb[9].mxu0 }
 0x18a   :  { %v2129_v38 = vadd.f32 %v2128_v21, %v2127_v40 }
 0x18c   :  { %v1426_v2 = vadd.f32 %v2129_v38, %v1288_v20 }
 0x191   :  { %v2162_v37 = vpop.f32.mrb[8].mxu1 }
 0x192   :  { %v2163_v17 = vpop.f32.mrb[9].mxu1 }
 0x193   :  { %v2164_v47 = vadd.f32 %v2163_v17, %v2162_v37 }
 0x195   :  { %v1534_v45 = vadd.f32 %v2164_v47, %v1426_v2 }
 0x1a8   :  { %v2197_v3 = vpop.f32.mrb[10].mxu0 }
 0x1a9   :  { %v2198_v25 = vpop.f32.mrb[11].mxu0 }
 0x1aa   :  { %v2199_v27 = vadd.f32 %v2198_v25, %v2197_v3 }
 0x1ac   :  { %v1702_v54 = vadd.f32 %v2199_v27, %v1534_v45 }
 0x1b1   :  { %v2232_v52 = vpop.f32.mrb[10].mxu1 }
 0x1b2   :  { %v2233_v35 = vpop.f32.mrb[11].mxu1 }
 0x1b3   :  { %v2234_v1 = vadd.f32 %v2233_v35, %v2232_v52 }
 0x1b5   :  { %v1806_v61 = vadd.f32 %v2234_v1, %v1702_v54 }
 0x1b7   :  { %1810 = vst.msk [vmem:[%s3721_s3] sm:$0xff] %vm1809_vm0, %v1806_v61 }

</bundles_post_ra>
